<compile_context>
chip_gen: v5e
topology: v5e:2x2
jax: 0.10.0
libtpu: 0.0.40
codegen_flags: <defaults>
</compile_context>

<pallas_src>
import functools

import jax
import jax.numpy as jnp
from jax.experimental import pallas as pl
from jax.experimental.pallas import tpu as pltpu


def _round_up(x, m):
    return ((x + m - 1) // m) * m


def _prob_module_kernel(x_ref, w1_ref, b1_ref, w2_ref, b2_ref, out_ref, *, compute_dtype):
    # x_ref:  (TB, 512)        w1_ref: (512, 64)   b1_ref: (1, 64)  f32
    # w2_ref: (64, M)          b2_ref: (1, M) f32  out_ref: (TB, M) f32
    x = x_ref[...].astype(compute_dtype)          # in-kernel cast: x stays f32 in HBM
    h = jnp.dot(x, w1_ref[...], preferred_element_type=jnp.float32) + b1_ref[...]
    h = jnp.maximum(h, 0.0)                       # ReLU in f32
    h = h.astype(compute_dtype)                   # bf16 or f32 for the second MXU pass
    out = jnp.dot(h, w2_ref[...], preferred_element_type=jnp.float32) + b2_ref[...]
    out_ref[...] = out.astype(out_ref.dtype)


def probability_module_forward(x, w1, b1, w2, b2, *, block_b=1024, use_bf16=False):
    """Forward pass of Probability_Module.

    x:  (B, 512) float32 activations.
    w1: (512, 64) fc1 weight, stored pre-transposed as (in, out).
    b1: (64,)
    w2: (64, M)   fc2 weight, stored pre-transposed as (in, out).
    b2: (M,)
    Returns (B, M) float32.
    """
    B, K = x.shape
    H = w1.shape[1]
    M = w2.shape[1]

    # ---- Batch tile selection ---------------------------------------------
    # Big tiles amortize the ~0.35 us per-grid-step overhead; clamp so the grid
    # has >=2 steps (when B allows) so the "parallel" axis can feed both v7x
    # TensorCores.  On v7x, block_b can be raised further (~2048) if desired.
    B8 = _round_up(B, 8)
    TB = min(_round_up(max(block_b, 8), 8), B8)
    if B8 > 8:
        TB = min(TB, _round_up(pl.cdiv(B8, 2), 8))
    grid = (pl.cdiv(B, TB),)   # ragged last block handled by Pallas (masked edge)

    if use_bf16:
        # bf16 MXU path (valid on v5e/v6e/v7x).  Only the tiny weights are cast
        # here (one-time); x is cast inside the kernel so no extra HBM pass is
        # added for the bandwidth-dominant activation.
        w1 = w1.astype(jnp.bfloat16)
        w2 = w2.astype(jnp.bfloat16)
        compute_dtype = jnp.bfloat16
    else:
        compute_dtype = jnp.float32

    b1_2d = b1.astype(jnp.float32).reshape(1, H)
    b2_2d = b2.astype(jnp.float32).reshape(1, M)

    flops = 2 * B * (K * H + H * M)
    bytes_accessed = (
        B * K * x.dtype.itemsize                       # x read
        + B * M * 4                                    # out write
        + K * H * w1.dtype.itemsize
        + H * M * w2.dtype.itemsize
        + (H + M) * 4                                  # biases
    )

    kernel = functools.partial(_prob_module_kernel, compute_dtype=compute_dtype)

    out = pl.pallas_call(
        kernel,
        out_shape=jax.ShapeDtypeStruct((B, M), jnp.float32),
        grid_spec=pltpu.PrefetchScalarGridSpec(
            num_scalar_prefetch=0,
            grid=grid,
            in_specs=[
                pl.BlockSpec((TB, K), lambda i: (i, 0)),   # x: tiled over batch (double-buffered)
                pl.BlockSpec((K, H), lambda i: (0, 0)),    # w1: constant index -> VMEM-resident
                pl.BlockSpec((1, H), lambda i: (0, 0)),    # b1
                pl.BlockSpec((H, M), lambda i: (0, 0)),    # w2
                pl.BlockSpec((1, M), lambda i: (0, 0)),    # b2
            ],
            # Unpadded (TB, M) output block: M is the full last dim (legal); the
            # masked store is only M*4 B/row, far cheaper than a 128-lane padded
            # writeback plus a post-kernel slice pass.
            out_specs=pl.BlockSpec((TB, M), lambda i: (i, 0)),
        ),
        compiler_params=pltpu.CompilerParams(
            # Batch tiles are independent: shard across both TCs on v7x, no-op elsewhere.
            dimension_semantics=("parallel",),
        ),
        cost_estimate=pl.CostEstimate(
            flops=flops, transcendentals=0, bytes_accessed=bytes_accessed),
    )(x, w1, b1_2d, w2, b2_2d)

    return out


if __name__ == "__main__":
    key = jax.random.PRNGKey(0)
    k_x, k_w1, k_b1, k_w2, k_b2 = jax.random.split(key, 5)

    batch = 32
    in_features = 512
    hidden = 64
    num_modes = 6

    # Deterministic synthetic parameters (shapes from nn.Linear(512,64), nn.Linear(64,num_modes)),
    # stored pre-transposed as (in, out) so the kernel computes x @ W (+ b).
    x = jax.random.normal(k_x, (batch, in_features), dtype=jnp.float32)
    w1 = jax.random.normal(k_w1, (in_features, hidden), dtype=jnp.float32) * 0.02
    b1 = jax.random.normal(k_b1, (hidden,), dtype=jnp.float32) * 0.02
    w2 = jax.random.normal(k_w2, (hidden, num_modes), dtype=jnp.float32) * 0.02
    b2 = jax.random.normal(k_b2, (num_modes,), dtype=jnp.float32) * 0.02

    # Plain-JAX reference.
    ref = jnp.maximum(x @ w1 + b1, 0.0) @ w2 + b2

    # f32 path with default tiling: B=32 -> TB=16, grid=(2,) so pipelining/parallel axis is exercised.
    out_f32 = probability_module_forward(x, w1, b1, w2, b2, use_bf16=False)
    out_f32 = jax.block_until_ready(out_f32)
    assert out_f32.shape == (batch, num_modes)
    assert jnp.allclose(out_f32, ref, atol=1e-4, rtol=1e-4)

    # Ragged batch (B not a multiple of the tile): exercises the cdiv grid + masked edge block.
    xr = x[:20]
    out_ragged = probability_module_forward(xr, w1, b1, w2, b2, block_b=16)
    out_ragged = jax.block_until_ready(out_ragged)
    assert out_ragged.shape == (20, num_modes)
    assert jnp.allclose(out_ragged, ref[:20], atol=1e-4, rtol=1e-4)

    # bf16 matmul path (x stays f32 in HBM, cast in-kernel); looser tolerance.
    out_bf16 = probability_module_forward(x, w1, b1, w2, b2, use_bf16=True)
    out_bf16 = jax.block_until_ready(out_bf16)
    assert out_bf16.shape == (batch, num_modes)
    assert jnp.allclose(out_bf16, ref, atol=3e-2, rtol=3e-2)

    print("KERNEL_OK")
</pallas_src>

<mosaic_0001>
module attributes {stable_mosaic.version = 11 : i64} {
  func.func @_prob_module_kernel(%arg0: i32, %arg1: memref<16x512xf32, #tpu.memory_space<vmem>>, %arg2: memref<512x64xf32, #tpu.memory_space<vmem>>, %arg3: memref<1x64xf32, #tpu.memory_space<vmem>>, %arg4: memref<64x6xf32, #tpu.memory_space<vmem>>, %arg5: memref<1x6xf32, #tpu.memory_space<vmem>>, %arg6: memref<16x6xf32, #tpu.memory_space<vmem>>) attributes {dimension_semantics = [#tpu.dimension_semantics<parallel>], iteration_bounds = array<i64: 2>, scalar_prefetch = 0 : i64, scratch_operands = 0 : i64, tpu.core_type = #tpu.core_type<tc>, window_params = [{transform_indices = @transform_0, window_bounds = array<i64: 16, 512>}, {pipeline_mode = #tpu.pipeline_mode<synchronous>, transform_indices = @transform_1, window_bounds = array<i64: 512, 64>}, {pipeline_mode = #tpu.pipeline_mode<synchronous>, transform_indices = @transform_2, window_bounds = array<i64: 1, 64>}, {pipeline_mode = #tpu.pipeline_mode<synchronous>, transform_indices = @transform_3, window_bounds = array<i64: 64, 6>}, {pipeline_mode = #tpu.pipeline_mode<synchronous>, transform_indices = @transform_4, window_bounds = array<i64: 1, 6>}, {transform_indices = @transform_5, window_bounds = array<i64: 16, 6>}]} {
    %c0 = arith.constant 0 : index
    %c0_0 = arith.constant 0 : index
    %0 = vector.load %arg1[%c0, %c0_0] : memref<16x512xf32, #tpu.memory_space<vmem>>, vector<16x512xf32>
    %c0_1 = arith.constant 0 : index
    %c0_2 = arith.constant 0 : index
    %1 = vector.load %arg2[%c0_1, %c0_2] : memref<512x64xf32, #tpu.memory_space<vmem>>, vector<512x64xf32>
    %cst = arith.constant dense<0.000000e+00> : vector<16x64xf32>
    %2 = tpu.matmul %0, %1, %cst {dimension_numbers = #tpu.dot_dimension_numbers<[1], [0], [0], [1], [0, 0, 1, 1], [], []>} : vector<16x512xf32>, vector<512x64xf32>, vector<16x64xf32> -> vector<16x64xf32>
    %c0_3 = arith.constant 0 : index
    %c0_4 = arith.constant 0 : index
    %3 = vector.load %arg3[%c0_3, %c0_4] : memref<1x64xf32, #tpu.memory_space<vmem>>, vector<1x64xf32>
    %4 = vector.broadcast %3 : vector<1x64xf32> to vector<16x64xf32>
    %5 = arith.addf %2, %4 : vector<16x64xf32>
    %cst_5 = arith.constant 0.000000e+00 : f32
    %6 = vector.broadcast %cst_5 : f32 to vector<16x64xf32>
    %7 = arith.maximumf %5, %6 : vector<16x64xf32>
    %c0_6 = arith.constant 0 : index
    %c0_7 = arith.constant 0 : index
    %8 = vector.load %arg4[%c0_6, %c0_7] : memref<64x6xf32, #tpu.memory_space<vmem>>, vector<64x6xf32>
    %cst_8 = arith.constant dense<0.000000e+00> : vector<16x6xf32>
    %9 = tpu.matmul %7, %8, %cst_8 {dimension_numbers = #tpu.dot_dimension_numbers<[1], [0], [0], [1], [0, 0, 1, 1], [], []>} : vector<16x64xf32>, vector<64x6xf32>, vector<16x6xf32> -> vector<16x6xf32>
    %c0_9 = arith.constant 0 : index
    %c0_10 = arith.constant 0 : index
    %10 = vector.load %arg5[%c0_9, %c0_10] : memref<1x6xf32, #tpu.memory_space<vmem>>, vector<1x6xf32>
    %11 = vector.broadcast %10 : vector<1x6xf32> to vector<16x6xf32>
    %12 = arith.addf %9, %11 : vector<16x6xf32>
    %c0_11 = arith.constant 0 : index
    %c0_12 = arith.constant 0 : index
    %13 = vector.load %arg6[%c0_11, %c0_12] : memref<16x6xf32, #tpu.memory_space<vmem>>, vector<16x6xf32>
    tpu.vector_store %arg6[%c0_11, %c0_12], %12 {strides = array<i32>} : memref<16x6xf32, #tpu.memory_space<vmem>>, vector<16x6xf32>,
    return
  }
  func.func @transform_0(%arg0: i32) -> (i32, i32) {
    %c0_i32 = arith.constant 0 : i32
    %c0_i32_0 = arith.constant 0 : i32
    return %arg0, %c0_i32 : i32, i32
  }
  func.func @transform_1(%arg0: i32) -> (i32, i32) {
    %c0_i32 = arith.constant 0 : i32
    %c0_i32_0 = arith.constant 0 : i32
    %c0_i32_1 = arith.constant 0 : i32
    return %c0_i32, %c0_i32_0 : i32, i32
  }
  func.func @transform_2(%arg0: i32) -> (i32, i32) {
    %c0_i32 = arith.constant 0 : i32
    %c0_i32_0 = arith.constant 0 : i32
    %c0_i32_1 = arith.constant 0 : i32
    return %c0_i32, %c0_i32_0 : i32, i32
  }
  func.func @transform_3(%arg0: i32) -> (i32, i32) {
    %c0_i32 = arith.constant 0 : i32
    %c0_i32_0 = arith.constant 0 : i32
    %c0_i32_1 = arith.constant 0 : i32
    return %c0_i32, %c0_i32_0 : i32, i32
  }
  func.func @transform_4(%arg0: i32) -> (i32, i32) {
    %c0_i32 = arith.constant 0 : i32
    %c0_i32_0 = arith.constant 0 : i32
    %c0_i32_1 = arith.constant 0 : i32
    return %c0_i32, %c0_i32_0 : i32, i32
  }
  func.func @transform_5(%arg0: i32) -> (i32, i32) {
    %c0_i32 = arith.constant 0 : i32
    %c0_i32_0 = arith.constant 0 : i32
    return %arg0, %c0_i32 : i32, i32
  }
}

</mosaic_0001>

<bundles_post_ra>
// kernel: tpu_custom_call.1
= control target key start
LH: loop header
LB: loop body
LE: loop exit
PB: predicated region body
PF: predicated region fallthrough
CT: control target
= control target key end

     0   :  { %s573_s18 = smov 0   ;;  %s834_s0 = inlined_call_operand.vmem [shape: f32[32,512], index: 0, kind: input, shape index: {}]   ;;  %s835_s1 = inlined_call_operand.vmem [shape: f32[512,64], index: 1, kind: input, shape index: {}]   ;;  %s836_s2 = inlined_call_operand.vmem [shape: f32[1,64], index: 2, kind: input, shape index: {}]   ;;  %s837_s3 = inlined_call_operand.vmem [shape: f32[64,6], index: 3, kind: input, shape index: {}]   ;;  %s838_s4 = inlined_call_operand.vmem [shape: f32[1,6], index: 4, kind: input, shape index: {}]   ;;  %s839_s5 = inlined_call_operand.vmem [shape: f32[32,6], index: 5, kind: output, shape index: {}]  }
   0x1 LB: > { %s502_s19 = sadd.s32 4294967295, %s541_s18   ;;  %p506_p0 = scmp.ge.s32.totalorder %s541_s18, 1  ;;  %s541_s18 = sphi %s573_s18, %s15_s18  }
   0x2   : > { %p189_p1 = scmp.lt.s32.totalorder %s541_s18, 3 }
   0x4   : > { %p190_p2 = pnand %p506_p0, %p189_p1 }
   0x5   : > { %s673_s9 = sshll.u32 (!%p190_p2), %s502_s19, 1 }
   0x6   : > { %193 = sbr.rel (%p190_p2) target bundleno = 319 (0x13f), region = 40  ;;  %p219_p3 = scmp.lt.s32.totalorder (!%p190_p2), %s673_s9, 3 }
   0xb   : > { %v286_v0 = vld [vmem:[%s835_s1 + $0x178] sm:$0xff]  ;;  %v285_v2 = vld [vmem:[%s835_s1 + $0x170] sm:$0xff]  ;;  %v284_v6 = vld [vmem:[%s835_s1 + $0x168] sm:$0xff]  ;;  %s841_s9 = smov (!%p219_p3, %s673_s9), 3  ;;  %vm413_vm0 = vcmask 523264   ;;  %vm443_vm1 = vcmask 48128  }
   0xc   : > { %v254_v1 = vld [vmem:[%s835_s1 + $0x78] sm:$0xff]  ;;  %353 = vmatpush.msra.mxu2 %v286_v0  ;;  %v253_v4 = vld [vmem:[%s835_s1 + $0x70] sm:$0xff]  ;;  %v252_v8 = vld [vmem:[%s835_s1 + $0x68] sm:$0xff]  ;;  %s516_s7 = sshll.u32 %s841_s9, 5 }
   0xd   : > { %307 = vmatpush.msra.mxu0 %v254_v1  ;;  %v302_v3 = vld [vmem:[%s835_s1 + $0x1f8] sm:$0xff]  ;;  %v301_v7 = vld [vmem:[%s835_s1 + $0x1f0] sm:$0xff]  ;;  %v300_v10 = vld [vmem:[%s835_s1 + $0x1e8] sm:$0xff]  ;;  %s769_s24 = scalar_lea.vmem %s834_s0, %s516_s7  ;;  %s511_s7 = sshll.u32 %s841_s9, 3 }
   0xe   : > { %v270_v5 = vld [vmem:[%s835_s1 + $0xf8] sm:$0xff]  ;;  %376 = vmatpush.msra.mxu3 %v302_v3  ;;  %354 = vmatpush.msra.mxu2 %v285_v2  ;;  %v269_v9 = vld [vmem:[%s835_s1 + $0xf0] sm:$0xff]  ;;  %v283_v11 = vld [vmem:[%s835_s1 + $0x160] sm:$0xff]  ;;  %s229_s13 = scalar_lea.vmem %s839_s5, %s511_s7 }
   0xf   : > { %330 = vmatpush.msra.mxu1 %v270_v5  ;;  %308 = vmatpush.msra.mxu0 %v253_v4  ;;  %v251_v12 = vld [vmem:[%s835_s1 + $0x60] sm:$0xff]  ;;  %v268_v13 = vld [vmem:[%s835_s1 + $0xe8] sm:$0xff]  ;;  %v282_v16 = vld [vmem:[%s835_s1 + $0x158] sm:$0xff] }
  0x10   : > { %377 = vmatpush.msra.mxu3 %v301_v7  ;;  %355 = vmatpush.msra.mxu2 %v284_v6  ;;  %v299_v14 = vld [vmem:[%s835_s1 + $0x1e0] sm:$0xff]  ;;  %v250_v17 = vld [vmem:[%s835_s1 + $0x58] sm:$0xff]  ;;  %v281_v20 = vld [vmem:[%s835_s1 + $0x150] sm:$0xff] }
  0x11   : > { %331 = vmatpush.msra.mxu1 %v269_v9  ;;  %309 = vmatpush.msra.mxu0 %v252_v8  ;;  %v267_v15 = vld [vmem:[%s835_s1 + $0xe0] sm:$0xff]  ;;  %v298_v18 = vld [vmem:[%s835_s1 + $0x1d8] sm:$0xff]  ;;  %v249_v21 = vld [vmem:[%s835_s1 + $0x50] sm:$0xff] }
  0x12   : > { %378 = vmatpush.msra.mxu3 %v300_v10  ;;  %356 = vmatpush.msra.mxu2 %v283_v11  ;;  %v266_v19 = vld [vmem:[%s835_s1 + $0xd8] sm:$0xff]  ;;  %v297_v22 = vld [vmem:[%s835_s1 + $0x1d0] sm:$0xff]  ;;  %v280_v24 = vld [vmem:[%s835_s1 + $0x148] sm:$0xff] }
  0x13   : > { %332 = vmatpush.msra.mxu1 %v268_v13  ;;  %310 = vmatpush.msra.mxu0 %v251_v12  ;;  %v265_v23 = vld [vmem:[%s835_s1 + $0xd0] sm:$0xff]  ;;  %v248_v25 = vld [vmem:[%s835_s1 + $0x48] sm:$0xff]  ;;  %v279_v28 = vld [vmem:[%s835_s1 + $0x140] sm:$0xff] }
  0x14   : > { %379 = vmatpush.msra.mxu3 %v299_v14  ;;  %357 = vmatpush.msra.mxu2 %v282_v16  ;;  %v296_v26 = vld [vmem:[%s835_s1 + $0x1c8] sm:$0xff]  ;;  %v247_v29 = vld [vmem:[%s835_s1 + $0x40] sm:$0xff]  ;;  %v278_v32 = vld [vmem:[%s835_s1 + $0x138] sm:$0xff] }
  0x15   : > { %333 = vmatpush.msra.mxu1 %v267_v15  ;;  %311 = vmatpush.msra.mxu0 %v250_v17  ;;  %v264_v27 = vld [vmem:[%s835_s1 + $0xc8] sm:$0xff]  ;;  %v295_v30 = vld [vmem:[%s835_s1 + $0x1c0] sm:$0xff]  ;;  %v246_v33 = vld [vmem:[%s835_s1 + $0x38] sm:$0xff] }
  0x16   : > { %380 = vmatpush.msra.mxu3 %v298_v18  ;;  %358 = vmatpush.msra.mxu2 %v281_v20  ;;  %v263_v31 = vld [vmem:[%s835_s1 + $0xc0] sm:$0xff]  ;;  %v294_v34 = vld [vmem:[%s835_s1 + $0x1b8] sm:$0xff]  ;;  %v277_v36 = vld [vmem:[%s835_s1 + $0x130] sm:$0xff] }
  0x17   : > { %334 = vmatpush.msra.mxu1 %v266_v19  ;;  %312 = vmatpush.msra.mxu0 %v249_v21  ;;  %v262_v35 = vld [vmem:[%s835_s1 + $0xb8] sm:$0xff]  ;;  %v245_v37 = vld [vmem:[%s835_s1 + $0x30] sm:$0xff]  ;;  %v276_v40 = vld [vmem:[%s835_s1 + $0x128] sm:$0xff] }
  0x18   : > { %381 = vmatpush.msra.mxu3 %v297_v22  ;;  %359 = vmatpush.msra.mxu2 %v280_v24  ;;  %v293_v38 = vld [vmem:[%s835_s1 + $0x1b0] sm:$0xff]  ;;  %v244_v41 = vld [vmem:[%s835_s1 + $0x28] sm:$0xff]  ;;  %v275_v44 = vld [vmem:[%s835_s1 + $0x120] sm:$0xff] }
  0x19   : > { %335 = vmatpush.msra.mxu1 %v265_v23  ;;  %313 = vmatpush.msra.mxu0 %v248_v25  ;;  %v261_v39 = vld [vmem:[%s835_s1 + $0xb0] sm:$0xff]  ;;  %v292_v42 = vld [vmem:[%s835_s1 + $0x1a8] sm:$0xff]  ;;  %v243_v45 = vld [vmem:[%s835_s1 + $0x20] sm:$0xff] }
  0x1a   : > { %382 = vmatpush.msra.mxu3 %v296_v26  ;;  %360 = vmatpush.msra.mxu2 %v279_v28  ;;  %v260_v43 = vld [vmem:[%s835_s1 + $0xa8] sm:$0xff]  ;;  %v291_v46 = vld [vmem:[%s835_s1 + $0x1a0] sm:$0xff]  ;;  %v274_v48 = vld [vmem:[%s835_s1 + $0x118] sm:$0xff] }
  0x1b   : > { %336 = vmatpush.msra.mxu1 %v264_v27  ;;  %314 = vmatpush.msra.mxu0 %v247_v29  ;;  %v259_v47 = vld [vmem:[%s835_s1 + $0xa0] sm:$0xff]  ;;  %v242_v49 = vld [vmem:[%s835_s1 + $0x18] sm:$0xff]  ;;  %v273_v52 = vld [vmem:[%s835_s1 + $0x110] sm:$0xff] }
  0x1c   : > { %383 = vmatpush.msra.mxu3 %v295_v30  ;;  %361 = vmatpush.msra.mxu2 %v278_v32  ;;  %v290_v50 = vld [vmem:[%s835_s1 + $0x198] sm:$0xff]  ;;  %v241_v53 = vld [vmem:[%s835_s1 + $0x10] sm:$0xff]  ;;  %v272_v56 = vld [vmem:[%s835_s1 + $0x108] sm:$0xff] }
  0x1d   : > { %337 = vmatpush.msra.mxu1 %v263_v31  ;;  %315 = vmatpush.msra.mxu0 %v246_v33  ;;  %v258_v51 = vld [vmem:[%s835_s1 + $0x98] sm:$0xff]  ;;  %v289_v54 = vld [vmem:[%s835_s1 + $0x190] sm:$0xff]  ;;  %v240_v57 = vld [vmem:[%s835_s1 + $0x8] sm:$0xff] }
  0x1e   : > { %384 = vmatpush.msra.mxu3 %v294_v34  ;;  %362 = vmatpush.msra.mxu2 %v277_v36  ;;  %v257_v55 = vld [vmem:[%s835_s1 + $0x90] sm:$0xff]  ;;  %v288_v58 = vld [vmem:[%s835_s1 + $0x188] sm:$0xff]  ;;  %v271_v60 = vld [vmem:[%s835_s1 + $0x100] sm:$0xff] }
  0x1f   : > { %338 = vmatpush.msra.mxu1 %v262_v35  ;;  %316 = vmatpush.msra.mxu0 %v245_v37  ;;  %v256_v59 = vld [vmem:[%s835_s1 + $0x88] sm:$0xff]  ;;  %v239_v61 = vld [vmem:[%s835_s1] sm:$0xff]  ;;  %v233_v62 = vld [vmem:[%s769_s24 + $0x10] sm:$0xff] }
  0x20   : > { %385 = vmatpush.msra.mxu3 %v293_v38  ;;  %363 = vmatpush.msra.mxu2 %v276_v40  ;;  %v287_v63 = vld [vmem:[%s835_s1 + $0x180] sm:$0xff]  ;;  %v234_v1 = vld [vmem:[%s769_s24 + $0x18] sm:$0xff]  ;;  %v232_v4 = vld [vmem:[%s769_s24 + $0x8] sm:$0xff] }
  0x21   : > { %339 = vmatpush.msra.mxu1 %v261_v39  ;;  %317 = vmatpush.msra.mxu0 %v244_v41  ;;  %v231_v0 = vld [vmem:[%s769_s24] sm:$0xff]  ;;  %v408_v3 = vld [vmem:[%s837_s3 + $0x38] sm:$0xff]  ;;  %v407_v5 = vld [vmem:[%s837_s3 + $0x30] sm:$0xff] }
  0x22   : > { %386 = vmatpush.msra.mxu3 %v292_v42  ;;  %364 = vmatpush.msra.mxu2 %v275_v44  ;;  %v255_v2 = vld [vmem:[%s835_s1 + $0x80] sm:$0xff]  ;;  %v237_v6 = vld [vmem:[%s769_s24 + $0x30] sm:$0xff]  ;;  %v238_v8 = vld [vmem:[%s769_s24 + $0x38] sm:$0xff] }
  0x23   : > { %340 = vmatpush.msra.mxu1 %v260_v43  ;;  %318 = vmatpush.msra.mxu0 %v243_v45  ;;  %v235_v7 = vld [vmem:[%s769_s24 + $0x20] sm:$0xff]  ;;  %v236_v9 = vld [vmem:[%s769_s24 + $0x28] sm:$0xff]  ;;  %v404_v12 = vld [vmem:[%s837_s3 + $0x18] sm:$0xff] }
  0x24   : > { %387 = vmatpush.msra.mxu3 %v291_v46  ;;  %365 = vmatpush.msra.mxu2 %v274_v48  ;;  %v406_v10 = vld [vmem:[%s837_s3 + $0x28] sm:$0xff]  ;;  %v405_v11 = vld [vmem:[%s837_s3 + $0x20] sm:$0xff]  ;;  %v403_v13 = vld [vmem:[%s837_s3 + $0x10] sm:$0xff] }
  0x25   : > { %341 = vmatpush.msra.mxu1 %v259_v47  ;;  %319 = vmatpush.msra.mxu0 %v242_v49  ;;  %v402_v14 = vld [vmem:[%s837_s3 + $0x8] sm:$0xff]  ;;  %v401_v15 = vld [vmem:[%s837_s3] sm:$0xff] }
  0x26   : > { %388 = vmatpush.msra.mxu3 %v290_v50  ;;  %366 = vmatpush.msra.mxu2 %v273_v52  ;;  %v533_v16 = vld [vmem:[%s836_s2] ss:$0 sm:$0xff] }
  0x27   : > { %342 = vmatpush.msra.mxu1 %v258_v51  ;;  %320 = vmatpush.msra.mxu0 %v241_v53  ;;  %v534_v35 = vld [vmem:[%s838_s4] ss:$0 sm:$0xff] }
  0x28   : > { %389 = vmatpush.msra.mxu3 %v289_v54  ;;  %367 = vmatpush.msra.mxu2 %v272_v56 }
  0x29   : > { %343 = vmatpush.msra.mxu1 %v257_v55  ;;  %321 = vmatpush.msra.mxu0 %v240_v57 }
  0x2a   : > { %390 = vmatpush.msra.mxu3 %v288_v58  ;;  %368 = vmatpush.msra.mxu2 %v271_v60 }
  0x2b   : > { %344 = vmatpush.msra.mxu1 %v256_v59  ;;  %322 = vmatpush.msra.mxu0 %v239_v61 }
  0x2c   : > { %369 = vmatmul.f32.vlgmr.msra.gmra.mxu2 %v233_v62  ;;  %391 = vmatpush.msra.mxu3 %v287_v63 }
  0x2d   : > { %323 = vmatmul.f32.vlgmr.msra.gmra.mxu0 %v231_v0  ;;  %392 = vmatmul.f32.vlgmr.msra.gmra.mxu3 %v234_v1 }
  0x2e   : > { %345 = vmatpush.msra.mxu1 %v255_v2  ;;  %428 = vmatpush.msrb.mxu0 %v408_v3 }
  0x2f   : > { %346 = vmatmul.f32.vlgmr.msra.gmra.mxu1 %v232_v4 }
  0x30   : > { %429 = vmatpush.msrb.mxu0 %v407_v5  ;;  %517 = vmatpush.msrb.mxu1 %v408_v3 }
  0x32   : > { %518 = vmatpush.msrb.mxu1 %v407_v5  ;;  %430 = vmatpush.msrb.mxu0 %v406_v10 }
  0x34   : > { %372 = vmatmul.f32.gmra.mxu2 %v237_v6  ;;  %519 = vmatpush.msrb.mxu1 %v406_v10 }
  0x35   : > { %326 = vmatmul.f32.gmra.mxu0 %v235_v7  ;;  %395 = vmatmul.f32.gmra.mxu3 %v238_v8 }
  0x36   : > { %431 = vmatpush.msrb.mxu0 %v405_v11  ;;  %520 = vmatpush.msrb.mxu1 %v405_v11 }
  0x37   : > { %349 = vmatmul.f32.gmra.mxu1 %v236_v9 }
  0x38   : > { %432 = vmatpush.msrb.mxu0 %v404_v12  ;;  %521 = vmatpush.msrb.mxu1 %v404_v12 }
  0x3a   : > { %433 = vmatpush.msrb.mxu0 %v403_v13  ;;  %522 = vmatpush.msrb.mxu1 %v403_v13 }
  0x3c   : > { %434 = vmatpush.msrb.mxu0 %v402_v14  ;;  %523 = vmatpush.msrb.mxu1 %v402_v14 }
  0x3e   : > { %435 = vmatpush.msrb.mxu0 %v401_v15  ;;  %524 = vmatpush.msrb.mxu1 %v401_v15 }
  0xaa   : > { %v324_v17 = vpop.f32.mrf.mxu0 }
  0xab   : > { %v325_v18 = vadd.f32 %v533_v16, %v324_v17 }
  0xac   : > { %v347_v19 = vpop.f32.mrf.mxu1 }
  0xad   : > { %v348_v20 = vadd.f32 %v347_v19, %v325_v18 }
  0xaf   : > { %v370_v21 = vpop.f32.mrf.mxu2 }
  0xb0   : > { %v371_v22 = vadd.f32 %v370_v21, %v348_v20  ;;  %v393_v23 = vpop.f32.mrf.mxu3 }
  0xb2   : > { %v394_v24 = vadd.f32 %v393_v23, %v371_v22  ;;  %v327_v25 = vpop.f32.mrf.mxu0 }
  0xb3   : > { %v328_v26 = vadd.f32 %v533_v16, %v327_v25 }
  0xb4   : > { %v399_v27 = vmax.f32 %v394_v24, 0.0  ;;  %v350_v28 = vpop.f32.mrf.mxu1 }
  0xb5   : > { %v351_v29 = vadd.f32 %v350_v28, %v328_v26 }
  0xb6   : > { %512 = vmatmul.msk.f32.vlgmr.msrb.gmra.mxu0 %vm413_vm0, %v399_v27 }
  0xb7   : > { %v373_v30 = vpop.f32.mrf.mxu2 }
  0xb8   : > { %v374_v31 = vadd.f32 %v373_v30, %v351_v29  ;;  %v396_v32 = vpop.f32.mrf.mxu3 }
  0xba   : > { %v397_v33 = vadd.f32 %v396_v32, %v374_v31 }
  0xbc   : > { %v400_v34 = vmax.f32 %v397_v33, 0.0 }
  0xbe   : > { %513 = vmatmul.msk.f32.vlgmr.msrb.gmra.mxu1 %vm413_vm0, %v400_v34 }
 0x133   : > { %v437_v36 = vpop.f32.mrf.mxu0 }
 0x134   : > { %v438_v37 = vadd.f32 %v534_v35, %v437_v36 }
 0x136   : > { %444 = vst.msk [vmem:[%s229_s13] sm:$0xff] %vm443_vm1, %v438_v37 }
 0x13b   : > { %v440_v38 = vpop.f32.mrf.mxu1 }
 0x13c   : > { %v441_v39 = vadd.f32 %v534_v35, %v440_v38 }
 0x13e   : > { %445 = vst.msk [vmem:[%s229_s13 + $0x8] sm:$0xff] %vm443_vm1, %v441_v39 }
 0x13f PF: > { %s15_s18 = sadd.s32 1, %s541_s18  }
 0x140   : > { %p12_p4 = scmp.ge.s32.totalorder %s15_s18, 4  }
 0x142   :  { %14 = sbr.rel (!%p12_p4) target bundleno = 1 (0x1), region = 70 }

</bundles_post_ra>
